<compile_context>
chip_gen: v6e
topology: v6e:2x2x1
jax: 0.10.0
libtpu: 0.0.40
codegen_flags: <defaults>
</compile_context>

<pallas_src>
import math

import jax
import jax.numpy as jnp
from jax.experimental import pallas as pl
from jax.experimental.pallas import tpu as pltpu

# Tile targets sized against v7x (64 MiB physical VMEM, 32 MiB default scoped): with bf16
# operands and double buffering this is only a few MiB live per grid step.
_TM, _TN, _TK = 256, 256, 512
_VMEM_LIMIT_BYTES = 32 * 1024 * 1024


# --------------------------- Tiled linear kernel --------------------------- #
def _matmul_bias_kernel(x_ref, w_ref, b_ref, o_ref, acc_ref):
    @pl.when(pl.program_id(2) == 0)
    def _():
        acc_ref[...] = jnp.zeros_like(acc_ref)

    acc_ref[...] += jnp.dot(x_ref[...], w_ref[...],
                            preferred_element_type=jnp.float32)

    @pl.when(pl.program_id(2) == pl.num_programs(2) - 1)
    def _():
        o_ref[...] = (acc_ref[...] + b_ref[...].astype(jnp.float32)).astype(o_ref.dtype)


def _pick_tile(dim, target, align):
    """Largest align-multiple tile <= target that divides dim (else the full dim)."""
    if dim <= target:
        return dim
    t = (target // align) * align
    while t >= align:
        if dim % t == 0:
            return t
        t -= align
    return dim


def linear(x, w, b, *, out_dtype, tm=_TM, tn=_TN, tk=_TK):
    """y = x @ w + b.  x: (M, K), w: (K, N), b: (N,) -> (M, N)."""
    M, K = x.shape
    K2, N = w.shape
    assert K == K2
    tm = _pick_tile(M, tm, 16)    # sublane-aligned (bf16 packs 16 rows per vreg)
    tn = _pick_tile(N, tn, 128)   # lane-aligned
    tk = _pick_tile(K, tk, 128)
    grid = (M // tm, N // tn, K // tk)
    return pl.pallas_call(
        _matmul_bias_kernel,
        out_shape=jax.ShapeDtypeStruct((M, N), out_dtype),
        grid=grid,
        in_specs=[
            pl.BlockSpec((tm, tk), lambda i, j, k: (i, k)),
            pl.BlockSpec((tk, tn), lambda i, j, k: (k, j)),
            pl.BlockSpec((1, tn), lambda i, j, k: (0, j)),
        ],
        out_specs=pl.BlockSpec((tm, tn), lambda i, j, k: (i, j)),
        scratch_shapes=[pltpu.VMEM((tm, tn), jnp.float32)],
        compiler_params=pltpu.CompilerParams(
            dimension_semantics=("parallel", "parallel", "arbitrary"),
            vmem_limit_bytes=_VMEM_LIMIT_BYTES),
    )(x, w, b.reshape(1, N))


# --------------------------- Attention kernel ------------------------------ #
def _make_attn_kernel(has_mask, has_probs):
    def kernel(*refs):
        q_ref, k_ref, v_ref = refs[0], refs[1], refs[2]
        n_in = 4 if has_mask else 3
        mask_ref = refs[3] if has_mask else None
        o_ref = refs[n_in]
        a_ref = refs[n_in + 1] if has_probs else None

        q = q_ref[0]   # (H, S, D); 1/sqrt(D) is already folded into the query projection
        k = k_ref[0]
        v = v_ref[0]

        # Batched over heads, contracting the last dim of both operands directly
        # (lowered to dot_general on the MXU; no materialized k.T / relayout copy).
        s = jnp.einsum("hqd,hkd->hqk", q, k, preferred_element_type=jnp.float32)
        if mask_ref is not None:
            s = jnp.where(mask_ref[0] == 1, -jnp.inf, s)

        # Softmax statistics stay in float32 (v5e has no bf16 VPU/EUP).
        m = jnp.max(s, axis=-1, keepdims=True)
        e = jnp.exp(s - m)
        denom = jnp.sum(e, axis=-1, keepdims=True)
        p = e * pl.reciprocal(denom, approx=True)   # EUP reciprocal, not an (S,S) divide

        if a_ref is not None:
            a_ref[0] = p.astype(a_ref.dtype)
        o_ref[0] = jnp.einsum("hqk,hkd->hqd", p.astype(v.dtype), v,
                              preferred_element_type=jnp.float32).astype(o_ref.dtype)

    return kernel


def scaled_dot_product_attention(q, k, v, mask=None, *, return_probs=True):
    """q/k/v: (B, H, S, D) (scale pre-folded into q).  Returns (out, probs | None)."""
    B, H, S, D = q.shape
    kernel = _make_attn_kernel(has_mask=mask is not None, has_probs=return_probs)

    in_specs = [pl.BlockSpec((1, H, S, D), lambda b: (b, 0, 0, 0))] * 3
    inputs = [q, k, v]
    if mask is not None:
        inputs.append(jnp.broadcast_to(mask, (B, H, S, S)).astype(jnp.int32))
        in_specs.append(pl.BlockSpec((1, H, S, S), lambda b: (b, 0, 0, 0)))

    out_shape = [jax.ShapeDtypeStruct((B, H, S, D), q.dtype)]
    out_specs = [pl.BlockSpec((1, H, S, D), lambda b: (b, 0, 0, 0))]
    if return_probs:
        out_shape.append(jax.ShapeDtypeStruct((B, H, S, S), jnp.float32))
        out_specs.append(pl.BlockSpec((1, H, S, S), lambda b: (b, 0, 0, 0)))

    res = pl.pallas_call(
        kernel,
        out_shape=tuple(out_shape),
        grid=(B,),
        in_specs=in_specs,
        out_specs=tuple(out_specs),
        compiler_params=pltpu.CompilerParams(
            dimension_semantics=("parallel",),
            vmem_limit_bytes=_VMEM_LIMIT_BYTES),
    )(*inputs)
    return (res[0], res[1]) if return_probs else (res[0], None)


# ------------------------------ Module glue -------------------------------- #
def init_params(key, embed_dim):
    """Deterministic init matching nn.Linear shapes: W (out, in), b (out,)."""
    keys = jax.random.split(key, 8)
    bound = 1.0 / (embed_dim ** 0.5)
    u = lambda k, shape: jax.random.uniform(k, shape, jnp.float32, -bound, bound)
    return {
        "wq": u(keys[0], (embed_dim, embed_dim)), "bq": u(keys[1], (embed_dim,)),
        "wk": u(keys[2], (embed_dim, embed_dim)), "bk": u(keys[3], (embed_dim,)),
        "wv": u(keys[4], (embed_dim, embed_dim)), "bv": u(keys[5], (embed_dim,)),
        "wo": u(keys[6], (embed_dim, embed_dim)), "bo": u(keys[7], (embed_dim,)),
    }


def multi_head_attention(x, params, num_heads, mask=None, *,
                         compute_dtype=jnp.bfloat16, return_attention=True):
    """x: (B, S, E) f32 -> (output (B, S, E) f32, attention (B, H, S, S) f32 | None)."""
    B, S, E = x.shape
    H = num_heads
    D = E // H
    scale = 1.0 / math.sqrt(D)

    # Fold the attention scale into the query projection (free) and fuse Q/K/V into one matmul.
    w_qkv = jnp.concatenate(
        [params["wq"].T * scale, params["wk"].T, params["wv"].T], axis=1)        # (E, 3E)
    b_qkv = jnp.concatenate([params["bq"] * scale, params["bk"], params["bv"]])  # (3E,)

    x2d = x.reshape(B * S, E).astype(compute_dtype)
    qkv = linear(x2d, w_qkv.astype(compute_dtype), b_qkv, out_dtype=compute_dtype)  # (B*S, 3E)

    # (B*S, 3E) -> (3, B, H, S, D)
    qkv = qkv.reshape(B, S, 3, H, D).transpose(2, 0, 3, 1, 4)
    qh, kh, vh = qkv[0], qkv[1], qkv[2]

    attn_out, attn = scaled_dot_product_attention(
        qh, kh, vh, mask=mask, return_probs=return_attention)

    merged = attn_out.transpose(0, 2, 1, 3).reshape(B * S, E)   # (B, H, S, D) -> (B*S, E)
    out = linear(merged, params["wo"].T.astype(compute_dtype), params["bo"],
                 out_dtype=jnp.float32).reshape(B, S, E)
    return out, attn


# ------------------------------- Reference --------------------------------- #
def reference_mha(x, params, num_heads, mask=None):
    B, S, E = x.shape
    D = E // num_heads
    lin = lambda t, w, b: t @ w.T + b
    q = lin(x, params["wq"], params["bq"]).reshape(B, S, num_heads, D).transpose(0, 2, 1, 3)
    k = lin(x, params["wk"], params["bk"]).reshape(B, S, num_heads, D).transpose(0, 2, 1, 3)
    v = lin(x, params["wv"], params["bv"]).reshape(B, S, num_heads, D).transpose(0, 2, 1, 3)
    scores = jnp.einsum("bhqd,bhkd->bhqk", q, k) / jnp.sqrt(jnp.float32(D))
    if mask is not None:
        scores = jnp.where(jnp.broadcast_to(mask, scores.shape) == 1, -jnp.inf, scores)
    attn = jax.nn.softmax(scores, axis=-1)
    o = jnp.einsum("bhqk,bhkd->bhqd", attn, v).transpose(0, 2, 1, 3).reshape(B, S, E)
    out = lin(o, params["wo"], params["bo"])
    return out, attn


if __name__ == "__main__":
    batch, seq, embed_dim, num_heads = 2, 8, 32, 4

    key = jax.random.PRNGKey(0)
    k_params, k_x = jax.random.split(key)
    params = init_params(k_params, embed_dim)
    x = jax.random.normal(k_x, (batch, seq, embed_dim), dtype=jnp.float32)

    ref_out, ref_attn = reference_mha(x, params, num_heads)

    # 1) float32 compute path — tight check of the kernel plumbing.
    out32, attn32 = multi_head_attention(x, params, num_heads, compute_dtype=jnp.float32)
    out32 = jax.block_until_ready(out32)
    attn32 = jax.block_until_ready(attn32)
    assert out32.shape == (batch, seq, embed_dim)
    assert attn32.shape == (batch, num_heads, seq, seq)
    assert jnp.allclose(out32, ref_out, atol=5e-3, rtol=5e-3)
    assert jnp.allclose(attn32, ref_attn, atol=5e-3, rtol=5e-3)

    # 2) default bfloat16 compute path (f32 accumulation / softmax statistics).
    out_bf, attn_bf = multi_head_attention(x, params, num_heads)
    out_bf = jax.block_until_ready(out_bf)
    attn_bf = jax.block_until_ready(attn_bf)
    assert jnp.allclose(out_bf, ref_out, atol=5e-2, rtol=5e-2)
    assert jnp.allclose(attn_bf, ref_attn, atol=5e-2, rtol=5e-2)

    # 3) optional mask (torch masked_fill(mask == 1, -inf) semantics), f32 path.
    causal_mask = (jnp.arange(seq)[None, :] > jnp.arange(seq)[:, None]).astype(jnp.int32)
    out_m, attn_m = multi_head_attention(x, params, num_heads, mask=causal_mask,
                                         compute_dtype=jnp.float32)
    out_m = jax.block_until_ready(out_m)
    ref_out_m, ref_attn_m = reference_mha(x, params, num_heads, mask=causal_mask)
    assert jnp.allclose(out_m, ref_out_m, atol=5e-3, rtol=5e-3)
    assert jnp.allclose(attn_m, ref_attn_m, atol=5e-3, rtol=5e-3)

    # 4) the (B,H,S,S) attention-probability writeback can be dropped when not needed.
    out_np, attn_np = multi_head_attention(x, params, num_heads, return_attention=False)
    out_np = jax.block_until_ready(out_np)
    assert attn_np is None
    assert jnp.allclose(out_np, ref_out, atol=5e-2, rtol=5e-2)

    print("KERNEL_OK")
</pallas_src>

<mosaic_0001>
module attributes {stable_mosaic.version = 11 : i64} {
  func.func @_matmul_bias_kernel(%arg0: i32, %arg1: i32, %arg2: i32, %arg3: memref<16x32xf32, #tpu.memory_space<vmem>>, %arg4: memref<32x96xf32, #tpu.memory_space<vmem>>, %arg5: memref<1x96xf32, #tpu.memory_space<vmem>>, %arg6: memref<16x96xf32, #tpu.memory_space<vmem>>, %arg7: memref<16x96xf32, #tpu.memory_space<vmem>>) attributes {dimension_semantics = [#tpu.dimension_semantics<parallel>, #tpu.dimension_semantics<parallel>, #tpu.dimension_semantics<arbitrary>], iteration_bounds = array<i64: 1, 1, 1>, scalar_prefetch = 0 : i64, scratch_operands = 1 : i64, tpu.core_type = #tpu.core_type<tc>, window_params = [{transform_indices = @transform_0, window_bounds = array<i64: 16, 32>}, {transform_indices = @transform_1, window_bounds = array<i64: 32, 96>}, {transform_indices = @transform_2, window_bounds = array<i64: 1, 96>}, {transform_indices = @transform_3, window_bounds = array<i64: 16, 96>}]} {
    %c0_i32 = arith.constant 0 : i32
    %0 = arith.cmpi eq, %arg2, %c0_i32 : i32
    %1 = arith.extui %0 : i1 to i32
    %c0_i32_0 = arith.constant 0 : i32
    %2 = arith.cmpi ne, %1, %c0_i32_0 : i32
    scf.if %2 {
      %cst_10 = arith.constant 0.000000e+00 : f32
      %12 = vector.broadcast %cst_10 : f32 to vector<16x96xf32>
      %c0_11 = arith.constant 0 : index
      %c0_12 = arith.constant 0 : index
      %13 = vector.load %arg7[%c0_11, %c0_12] : memref<16x96xf32, #tpu.memory_space<vmem>>, vector<16x96xf32>
      tpu.vector_store %arg7[%c0_11, %c0_12], %12 {strides = array<i32>} : memref<16x96xf32, #tpu.memory_space<vmem>>, vector<16x96xf32>,
    } else {
    }
    %c0 = arith.constant 0 : index
    %c0_1 = arith.constant 0 : index
    %3 = vector.load %arg7[%c0, %c0_1] : memref<16x96xf32, #tpu.memory_space<vmem>>, vector<16x96xf32>
    %c0_2 = arith.constant 0 : index
    %c0_3 = arith.constant 0 : index
    %4 = vector.load %arg3[%c0_2, %c0_3] : memref<16x32xf32, #tpu.memory_space<vmem>>, vector<16x32xf32>
    %c0_4 = arith.constant 0 : index
    %c0_5 = arith.constant 0 : index
    %5 = vector.load %arg4[%c0_4, %c0_5] : memref<32x96xf32, #tpu.memory_space<vmem>>, vector<32x96xf32>
    %cst = arith.constant dense<0.000000e+00> : vector<16x96xf32>
    %6 = tpu.matmul %4, %5, %cst {dimension_numbers = #tpu.dot_dimension_numbers<[1], [0], [0], [1], [0, 0, 1, 1], [], []>} : vector<16x32xf32>, vector<32x96xf32>, vector<16x96xf32> -> vector<16x96xf32>
    %7 = arith.addf %3, %6 : vector<16x96xf32>
    %c0_6 = arith.constant 0 : index
    %c0_7 = arith.constant 0 : index
    %8 = vector.load %arg7[%c0_6, %c0_7] : memref<16x96xf32, #tpu.memory_space<vmem>>, vector<16x96xf32>
    tpu.vector_store %arg7[%c0_6, %c0_7], %7 {strides = array<i32>} : memref<16x96xf32, #tpu.memory_space<vmem>>, vector<16x96xf32>,
    %c0_i32_8 = arith.constant 0 : i32
    %9 = arith.cmpi eq, %arg2, %c0_i32_8 : i32
    %10 = arith.extui %9 : i1 to i32
    %c0_i32_9 = arith.constant 0 : i32
    %11 = arith.cmpi ne, %10, %c0_i32_9 : i32
    scf.if %11 {
      %c0_10 = arith.constant 0 : index
      %c0_11 = arith.constant 0 : index
      %12 = vector.load %arg7[%c0_10, %c0_11] : memref<16x96xf32, #tpu.memory_space<vmem>>, vector<16x96xf32>
      %c0_12 = arith.constant 0 : index
      %c0_13 = arith.constant 0 : index
      %13 = vector.load %arg5[%c0_12, %c0_13] : memref<1x96xf32, #tpu.memory_space<vmem>>, vector<1x96xf32>
      %14 = vector.broadcast %13 : vector<1x96xf32> to vector<16x96xf32>
      %15 = arith.addf %12, %14 : vector<16x96xf32>
      %c0_14 = arith.constant 0 : index
      %c0_15 = arith.constant 0 : index
      %16 = vector.load %arg6[%c0_14, %c0_15] : memref<16x96xf32, #tpu.memory_space<vmem>>, vector<16x96xf32>
      tpu.vector_store %arg6[%c0_14, %c0_15], %15 {strides = array<i32>} : memref<16x96xf32, #tpu.memory_space<vmem>>, vector<16x96xf32>,
    } else {
    }
    return
  }
  func.func @transform_0(%arg0: i32, %arg1: i32, %arg2: i32) -> (i32, i32) {
    %c0_i32 = arith.constant 0 : i32
    return %arg0, %arg2 : i32, i32
  }
  func.func @transform_1(%arg0: i32, %arg1: i32, %arg2: i32) -> (i32, i32) {
    %c0_i32 = arith.constant 0 : i32
    return %arg2, %arg1 : i32, i32
  }
  func.func @transform_2(%arg0: i32, %arg1: i32, %arg2: i32) -> (i32, i32) {
    %c0_i32 = arith.constant 0 : i32
    %c0_i32_0 = arith.constant 0 : i32
    return %c0_i32, %arg1 : i32, i32
  }
  func.func @transform_3(%arg0: i32, %arg1: i32, %arg2: i32) -> (i32, i32) {
    %c0_i32 = arith.constant 0 : i32
    return %arg0, %arg1 : i32, i32
  }
}

</mosaic_0001>

<bundles_post_ra>
// kernel: tpu_custom_call.1
= control target key start
LH: loop header
LB: loop body
LE: loop exit
PB: predicated region body
PF: predicated region fallthrough
CT: control target
= control target key end

     0   :  { %8 = vsyncpa [#allocation4], 0  ;;  %s326_s0 = inlined_call_operand.hbm [shape: f32[16,32], index: 0, kind: input, shape index: {}]   ;;  %s327_s1 = inlined_call_operand.hbm [shape: f32[32,96], index: 1, kind: input, shape index: {}]   ;;  %s328_s2 = inlined_call_operand.vmem [shape: f32[1,96], index: 2, kind: input, shape index: {}]   ;;  %s329_s3 = inlined_call_operand.hbm [shape: f32[16,96], index: 3, kind: output, shape index: {}]  }
   0x1   :  { %9 = vsyncpa [#allocation7], 0 }
   0x2   :  { %10 = vsyncpa [#allocation5], 0  ;;  %s271_s12 = smov [#allocation3]  }
   0x3   :  { %s16_s13 = sshll.u32 %s271_s12, 4  ;;  %s17_s13 = int_to_ptr.vmem [resolvable:$true] %s16_s13 }
   0x4   :  { %s213_s14 = scalar_lea.vmem %s17_s13, 256  ;;  %p218_p1 = scmp.lt.s32.totalorder %s17_s13, %s17_s13 }
   0x5   :  { %p214_p0 = scmp.ne.s32.totalorder %s17_s13, %s213_s14  ;;  %p219_p2 = scmp.lt.s32.totalorder %s213_s14, %s213_s14 }
   0x7   :  { %p220_p3 = por %p219_p2, %p218_p1 }
   0x9   :  { %p221_p4 = pnand %p220_p3, %p214_p0 }
   0xb   :  { %224 = shalt.err (!%p221_p4)
}
   0xc   :  { %s272_s15 = smov 128   ;;  %s273_s16 = smov 8  }
   0xd   :  { %22 = dma.hbm_to_vmem [thread:$0]  %s326_s0, 256, %s17_s13, [#allocation4], %s272_s15, %s272_s15, %s273_s16  }
   0xe   :  { %s274_s19 = smov [#allocation6]  }
   0xf   :  { %s28_s20 = sshll.u32 %s274_s19, 4  ;;  %s29_s20 = int_to_ptr.vmem [resolvable:$true] %s28_s20 }
  0x10   :  { %s233_s21 = scalar_lea.vmem %s29_s20, 512  ;;  %p238_p6 = scmp.lt.s32.totalorder %s29_s20, %s29_s20 }
  0x11   :  { %p234_p5 = scmp.ne.s32.totalorder %s29_s20, %s233_s21  ;;  %p239_p7 = scmp.lt.s32.totalorder %s233_s21, %s233_s21 }
  0x13   :  { %p240_p8 = por %p239_p7, %p238_p6 }
  0x15   :  { %p241_p9 = pnand %p240_p8, %p234_p5 }
  0x17   :  { %244 = shalt.err (!%p241_p9)
}
  0x18   :  { %34 = dma.hbm_to_vmem [thread:$0]  %s327_s1, 512, %s29_s20, [#allocation7], %s272_s15, %s272_s15, %s273_s16  }
  0x19   :  { %265 = dma.done.wait [#allocation4], 256  }
  0x1a   :  { %266 = vsyncadd [#allocation4], 4294967040 }
  0x1b   :  { %267 = dma.done.wait [#allocation7], 512  }
  0x1c   :  { %268 = vsyncadd [#allocation7], 4294966784  ;;  %vm47_vm0 = vcmask 785408   ;;  %v275_v0 = vmov 0.0   ;;  %vm58_vm1 = vcmask 261120   ;;  %v57_v1 = vld [vmem:[#allocation6 + $0x18] sm:$0xff] }
  0x1d   :  { %49 = vst.msk [vmem:[#allocation2 + $0x8] sm:$0xff] %vm47_vm0, %v275_v0  ;;  %48 = vst.msk [vmem:[#allocation2] sm:$0xff] %vm47_vm0, %v275_v0  ;;  %v56_v2 = vld [vmem:[#allocation6 + $0x10] sm:$0xff]  ;;  %188 = vmatprep.subr.mxu0 %v57_v1  ;;  %v55_v4 = vld [vmem:[#allocation6 + $0x8] sm:$0xff]  ;;  %s276_s24 = smov [#allocation8]  }
  0x1e   :  { %v52_v3 = vld [vmem:[#allocation3] sm:$0xff]  ;;  %189 = vmatpush3.msra.mxu0 %v57_v1  ;;  %v54_v5 = vld [vmem:[#allocation6] sm:$0xff]  ;;  %v53_v6 = vld [vmem:[#allocation3 + $0x8] sm:$0xff]  ;;  %s166_s25 = sshll.u32 %s276_s24, 4  ;;  %s167_s25 = int_to_ptr.vmem [resolvable:$true] %s166_s25 }
  0x1f   :  { %196 = vmatprep.mubr.msk.f32.mxu0 %vm58_vm1, %v52_v3  ;;  %190 = vmatprep.subr.mxu0 %v56_v2  ;;  %v181_v13 = vld [vmem:[%s328_s2] ss:$0 sm:$0xff]  ;;  %s245_s26 = scalar_lea.vmem %s167_s25, 256  ;;  %p250_p11 = scmp.lt.s32.totalorder %s167_s25, %s167_s25 }
  0x20   :  { %191 = vmatpush3.msra.mxu0 %v56_v2  ;;  %p246_p10 = scmp.ne.s32.totalorder %s167_s25, %s245_s26  ;;  %p251_p12 = scmp.lt.s32.totalorder %s245_s26, %s245_s26 }
  0x21   :  { %192 = vmatprep.subr.mxu0 %v55_v4 }
  0x22   :  { %193 = vmatpush3.msra.mxu0 %v55_v4  ;;  %p252_p13 = por %p251_p12, %p250_p11 }
  0x23   :  { %194 = vmatprep.subr.mxu0 %v54_v5 }
  0x24   :  { %195 = vmatpush3.msra.mxu0 %v54_v5  ;;  %v51_v7 = vld [vmem:[#allocation2 + $0x8] sm:$0xff]  ;;  %v50_v9 = vld [vmem:[#allocation2] sm:$0xff]  ;;  %p253_p0 = pnand %p252_p13, %p246_p10 }
  0x25   :  { %197 = vmatmul.mubr.msk.f32.vlgmr.msra.gmra.mxu0 %vm58_vm1, %v53_v6 }
  0xe5   :  { %v198_v8 = vpop.f32.mrf.mxu0 }
  0xe6   :  { %v141_v10 = vadd.f32 %v198_v8, %v51_v7 }
  0xe7   :  { %v131_v11 = vpop.f32.mrf.mxu0 }
  0xe8   :  { %144 = vst.msk [vmem:[#allocation2 + $0x8] sm:$0xff] %vm47_vm0, %v141_v10  ;;  %v140_v12 = vadd.f32 %v131_v11, %v50_v9 }
  0xea   :  { %143 = vst.msk [vmem:[#allocation2] sm:$0xff] %vm47_vm0, %v140_v12 }
  0xef   :  { %v149_v14 = vld [vmem:[#allocation2 + $0x8] sm:$0xff] }
  0xf0   :  { %v158_v15 = vadd.f32 %v181_v13, %v149_v14 }
  0xf1   :  { %v148_v16 = vld [vmem:[#allocation2] sm:$0xff] }
  0xf2   :  { %v157_v17 = vadd.f32 %v181_v13, %v148_v16  ;;  %160 = vst.msk [vmem:[#allocation8 + $0x8] sm:$0xff] %vm47_vm0, %v158_v15 }
  0xf4   :  { %159 = vst.msk [vmem:[#allocation8] sm:$0xff] %vm47_vm0, %v157_v17 }
  0xf5   :  { %256 = shalt.err (!%p253_p0)
}
  0xf6   :  { %172 = dma.vmem_to_hbm [thread:$0]  %s167_s25, 256, %s329_s3, [#allocation5], %s272_s15, %s272_s15, %s273_s16  }
  0xf7   :  { %269 = dma.done.wait [#allocation5], 256  }
  0xf8   :  { %270 = vsyncadd [#allocation5], 4294967040 }
  0xf9   :  { %176 = vsyncpa [#allocation4], 1 }
  0xfa   :  { %177 = vsyncpa [#allocation7], 1 }
  0xfb   :  { %178 = vsyncpa [#allocation5], 1 }

</bundles_post_ra>
